<compile_context>
chip_gen: v5e
topology: v5e:2x2
jax: 0.10.0
libtpu: 0.0.40
codegen_flags: <defaults>
</compile_context>

<pallas_src>
import functools

import jax
import jax.numpy as jnp
from jax.experimental import pallas as pl
from jax.experimental.pallas import tpu as pltpu


def _round_up(x, m):
    return ((x + m - 1) // m) * m


def _mlp_kernel(x_ref, w1_ref, b1_ref, w2_ref, b2_ref, w3_ref, b3_ref, out_ref):
    # One batch tile per grid step: three MXU matmuls + VPU bias/ReLU, all in VMEM.
    x = x_ref[...].astype(jnp.float32)

    h1 = jnp.dot(x, w1_ref[...], preferred_element_type=jnp.float32) + b1_ref[...]
    h1 = jnp.maximum(h1, 0.0)

    h2 = jnp.dot(h1, w2_ref[...], preferred_element_type=jnp.float32) + b2_ref[...]
    h2 = jnp.maximum(h2, 0.0)

    h3 = jnp.dot(h2, w3_ref[...], preferred_element_type=jnp.float32) + b3_ref[...]
    out_ref[...] = h3.astype(out_ref.dtype)  # lane-dense (TB, 128) store


@functools.partial(jax.jit, static_argnames=("block_b",))
def mlp_forward(x, params, *, block_b=256):
    """3-layer MLP forward pass in a single batched Pallas kernel.

    x: (B, C_in) float32. Returns (B, num_actions) float32.
    """
    w1, b1, w2, b2, w3, b3 = params
    B, C_in = x.shape
    num_actions = w3.shape[1]

    # --- lane-dense output: pad last layer out to a multiple of 128 lanes ---
    a_pad = _round_up(max(num_actions, 128), 128)
    w3_p = jnp.pad(w3, ((0, 0), (0, a_pad - num_actions)))
    b3_p = jnp.pad(b3, ((0, 0), (0, a_pad - num_actions)))

    # --- batch tiling: TB multiple of 8 (sublane), capped at block_b ---
    tb = min(block_b, _round_up(B, 8))
    b_pad = _round_up(B, tb)
    x_p = jnp.pad(x, ((0, b_pad - B), (0, 0)))
    grid = (b_pad // tb,)

    # Weights/biases: constant block index -> single DMA, VMEM-resident across steps.
    resident = lambda shape: pl.BlockSpec(shape, lambda i: (0,) * len(shape))

    flops = 2 * B * (C_in * 50 + 50 * 30 + 30 * num_actions)
    bytes_accessed = 4 * (
        x.size + w1.size + b1.size + w2.size + b2.size + w3_p.size + b3_p.size
        + b_pad * a_pad
    )

    out = pl.pallas_call(
        _mlp_kernel,
        out_shape=jax.ShapeDtypeStruct((b_pad, a_pad), jnp.float32),
        grid=grid,
        in_specs=[
            pl.BlockSpec((tb, C_in), lambda i: (i, 0)),   # x: tiled over batch
            resident(w1.shape), resident(b1.shape),
            resident(w2.shape), resident(b2.shape),
            resident(w3_p.shape), resident(b3_p.shape),
        ],
        out_specs=pl.BlockSpec((tb, a_pad), lambda i: (i, 0)),
        compiler_params=pltpu.CompilerParams(
            dimension_semantics=("parallel",),
        ),
        cost_estimate=pl.CostEstimate(
            flops=flops, transcendentals=0, bytes_accessed=bytes_accessed
        ),
    )(x_p, w1, b1, w2, b2, w3_p, b3_p)

    return out[:B, :num_actions]


def init_params(key, input_channels, num_actions):
    """Deterministic init matching PyTorch nn.Linear default (uniform +-1/sqrt(fan_in))."""
    dims = [(input_channels, 50), (50, 30), (30, num_actions)]
    params = []
    for fan_in, fan_out in dims:
        kw, kb, key = jax.random.split(key, 3)
        bound = 1.0 / (fan_in ** 0.5)
        w = jax.random.uniform(kw, (fan_in, fan_out), jnp.float32, -bound, bound)
        # bias kept 2D (1, out) for TPU-friendly layout; broadcasts over batch.
        b = jax.random.uniform(kb, (1, fan_out), jnp.float32, -bound, bound)
        params.extend([w, b])
    return tuple(params)


def reference_forward(x, params):
    w1, b1, w2, b2, w3, b3 = params
    h = jnp.maximum(x @ w1 + b1, 0.0)
    h = jnp.maximum(h @ w2 + b2, 0.0)
    return h @ w3 + b3


if __name__ == "__main__":
    key = jax.random.PRNGKey(0)
    input_channels = 34   # flat feature vector length (module's input_channels)
    num_actions = 6       # bomberman action space

    kx1, kx2, kp = jax.random.split(key, 3)
    params = init_params(kp, input_channels, num_actions)

    # Small batch (single grid step, batch padded to a sublane multiple).
    x_small = jax.random.normal(kx1, (8, input_channels), jnp.float32)
    out_small = mlp_forward(x_small, params)
    jax.block_until_ready(out_small)
    ref_small = reference_forward(x_small, params)
    assert out_small.shape == (8, num_actions)
    assert jnp.allclose(out_small, ref_small, atol=1e-4, rtol=1e-4)

    # Larger ragged batch (multiple grid steps + batch padding exercised).
    x_big = jax.random.normal(kx2, (300, input_channels), jnp.float32)
    out_big = mlp_forward(x_big, params, block_b=128)
    jax.block_until_ready(out_big)
    ref_big = reference_forward(x_big, params)
    assert out_big.shape == (300, num_actions)
    assert jnp.allclose(out_big, ref_big, atol=1e-4, rtol=1e-4)

    print("KERNEL_OK")
</pallas_src>

<mosaic_0001>
module attributes {stable_mosaic.version = 11 : i64} {
  func.func @_mlp_kernel(%arg0: i32, %arg1: memref<8x34xf32, #tpu.memory_space<vmem>>, %arg2: memref<34x50xf32, #tpu.memory_space<vmem>>, %arg3: memref<1x50xf32, #tpu.memory_space<vmem>>, %arg4: memref<50x30xf32, #tpu.memory_space<vmem>>, %arg5: memref<1x30xf32, #tpu.memory_space<vmem>>, %arg6: memref<30x128xf32, #tpu.memory_space<vmem>>, %arg7: memref<1x128xf32, #tpu.memory_space<vmem>>, %arg8: memref<8x128xf32, #tpu.memory_space<vmem>>) attributes {dimension_semantics = [#tpu.dimension_semantics<parallel>], iteration_bounds = array<i64: 1>, scalar_prefetch = 0 : i64, scratch_operands = 0 : i64, tpu.core_type = #tpu.core_type<tc>, window_params = [{transform_indices = @transform_0, window_bounds = array<i64: 8, 34>}, {pipeline_mode = #tpu.pipeline_mode<synchronous>, transform_indices = @transform_1, window_bounds = array<i64: 34, 50>}, {pipeline_mode = #tpu.pipeline_mode<synchronous>, transform_indices = @transform_2, window_bounds = array<i64: 1, 50>}, {pipeline_mode = #tpu.pipeline_mode<synchronous>, transform_indices = @transform_3, window_bounds = array<i64: 50, 30>}, {pipeline_mode = #tpu.pipeline_mode<synchronous>, transform_indices = @transform_4, window_bounds = array<i64: 1, 30>}, {pipeline_mode = #tpu.pipeline_mode<synchronous>, transform_indices = @transform_5, window_bounds = array<i64: 30, 128>}, {pipeline_mode = #tpu.pipeline_mode<synchronous>, transform_indices = @transform_6, window_bounds = array<i64: 1, 128>}, {transform_indices = @transform_7, window_bounds = array<i64: 8, 128>}]} {
    %c0 = arith.constant 0 : index
    %c0_0 = arith.constant 0 : index
    %0 = vector.load %arg1[%c0, %c0_0] : memref<8x34xf32, #tpu.memory_space<vmem>>, vector<8x34xf32>
    %c0_1 = arith.constant 0 : index
    %c0_2 = arith.constant 0 : index
    %1 = vector.load %arg2[%c0_1, %c0_2] : memref<34x50xf32, #tpu.memory_space<vmem>>, vector<34x50xf32>
    %cst = arith.constant dense<0.000000e+00> : vector<8x50xf32>
    %2 = tpu.matmul %0, %1, %cst {dimension_numbers = #tpu.dot_dimension_numbers<[1], [0], [0], [1], [0, 0, 1, 1], [], []>} : vector<8x34xf32>, vector<34x50xf32>, vector<8x50xf32> -> vector<8x50xf32>
    %c0_3 = arith.constant 0 : index
    %c0_4 = arith.constant 0 : index
    %3 = vector.load %arg3[%c0_3, %c0_4] : memref<1x50xf32, #tpu.memory_space<vmem>>, vector<1x50xf32>
    %4 = vector.broadcast %3 : vector<1x50xf32> to vector<8x50xf32>
    %5 = arith.addf %2, %4 : vector<8x50xf32>
    %cst_5 = arith.constant 0.000000e+00 : f32
    %6 = vector.broadcast %cst_5 : f32 to vector<8x50xf32>
    %7 = arith.maximumf %5, %6 : vector<8x50xf32>
    %c0_6 = arith.constant 0 : index
    %c0_7 = arith.constant 0 : index
    %8 = vector.load %arg4[%c0_6, %c0_7] : memref<50x30xf32, #tpu.memory_space<vmem>>, vector<50x30xf32>
    %cst_8 = arith.constant dense<0.000000e+00> : vector<8x30xf32>
    %9 = tpu.matmul %7, %8, %cst_8 {dimension_numbers = #tpu.dot_dimension_numbers<[1], [0], [0], [1], [0, 0, 1, 1], [], []>} : vector<8x50xf32>, vector<50x30xf32>, vector<8x30xf32> -> vector<8x30xf32>
    %c0_9 = arith.constant 0 : index
    %c0_10 = arith.constant 0 : index
    %10 = vector.load %arg5[%c0_9, %c0_10] : memref<1x30xf32, #tpu.memory_space<vmem>>, vector<1x30xf32>
    %11 = vector.broadcast %10 : vector<1x30xf32> to vector<8x30xf32>
    %12 = arith.addf %9, %11 : vector<8x30xf32>
    %cst_11 = arith.constant 0.000000e+00 : f32
    %13 = vector.broadcast %cst_11 : f32 to vector<8x30xf32>
    %14 = arith.maximumf %12, %13 : vector<8x30xf32>
    %c0_12 = arith.constant 0 : index
    %c0_13 = arith.constant 0 : index
    %15 = vector.load %arg6[%c0_12, %c0_13] : memref<30x128xf32, #tpu.memory_space<vmem>>, vector<30x128xf32>
    %cst_14 = arith.constant dense<0.000000e+00> : vector<8x128xf32>
    %16 = tpu.matmul %14, %15, %cst_14 {dimension_numbers = #tpu.dot_dimension_numbers<[1], [0], [0], [1], [0, 0, 1, 1], [], []>} : vector<8x30xf32>, vector<30x128xf32>, vector<8x128xf32> -> vector<8x128xf32>
    %c0_15 = arith.constant 0 : index
    %c0_16 = arith.constant 0 : index
    %17 = vector.load %arg7[%c0_15, %c0_16] : memref<1x128xf32, #tpu.memory_space<vmem>>, vector<1x128xf32>
    %18 = vector.broadcast %17 : vector<1x128xf32> to vector<8x128xf32>
    %19 = arith.addf %16, %18 : vector<8x128xf32>
    %c0_17 = arith.constant 0 : index
    %c0_18 = arith.constant 0 : index
    %20 = vector.load %arg8[%c0_17, %c0_18] : memref<8x128xf32, #tpu.memory_space<vmem>>, vector<8x128xf32>
    tpu.vector_store %arg8[%c0_17, %c0_18], %19 {strides = array<i32>} : memref<8x128xf32, #tpu.memory_space<vmem>>, vector<8x128xf32>,
    return
  }
  func.func @transform_0(%arg0: i32) -> (i32, i32) {
    %c0_i32 = arith.constant 0 : i32
    %c0_i32_0 = arith.constant 0 : i32
    return %arg0, %c0_i32 : i32, i32
  }
  func.func @transform_1(%arg0: i32) -> (i32, i32) {
    %c0_i32 = arith.constant 0 : i32
    %c0_i32_0 = arith.constant 0 : i32
    %c0_i32_1 = arith.constant 0 : i32
    return %c0_i32, %c0_i32_0 : i32, i32
  }
  func.func @transform_2(%arg0: i32) -> (i32, i32) {
    %c0_i32 = arith.constant 0 : i32
    %c0_i32_0 = arith.constant 0 : i32
    %c0_i32_1 = arith.constant 0 : i32
    return %c0_i32, %c0_i32_0 : i32, i32
  }
  func.func @transform_3(%arg0: i32) -> (i32, i32) {
    %c0_i32 = arith.constant 0 : i32
    %c0_i32_0 = arith.constant 0 : i32
    %c0_i32_1 = arith.constant 0 : i32
    return %c0_i32, %c0_i32_0 : i32, i32
  }
  func.func @transform_4(%arg0: i32) -> (i32, i32) {
    %c0_i32 = arith.constant 0 : i32
    %c0_i32_0 = arith.constant 0 : i32
    %c0_i32_1 = arith.constant 0 : i32
    return %c0_i32, %c0_i32_0 : i32, i32
  }
  func.func @transform_5(%arg0: i32) -> (i32, i32) {
    %c0_i32 = arith.constant 0 : i32
    %c0_i32_0 = arith.constant 0 : i32
    %c0_i32_1 = arith.constant 0 : i32
    return %c0_i32, %c0_i32_0 : i32, i32
  }
  func.func @transform_6(%arg0: i32) -> (i32, i32) {
    %c0_i32 = arith.constant 0 : i32
    %c0_i32_0 = arith.constant 0 : i32
    %c0_i32_1 = arith.constant 0 : i32
    return %c0_i32, %c0_i32_0 : i32, i32
  }
  func.func @transform_7(%arg0: i32) -> (i32, i32) {
    %c0_i32 = arith.constant 0 : i32
    %c0_i32_0 = arith.constant 0 : i32
    return %arg0, %c0_i32 : i32, i32
  }
}

</mosaic_0001>

<bundles_post_ra>
// kernel: mlp_forward.1
= control target key start
LH: loop header
LB: loop body
LE: loop exit
PB: predicated region body
PF: predicated region fallthrough
CT: control target
= control target key end

     0   :  { %vm41_vm0 = vcmask 1041408   ;;  %s298_s0 = inlined_call_operand.vmem [shape: f32[8,34], index: 0, kind: input, shape index: {}]   ;;  %s299_s1 = inlined_call_operand.vmem [shape: f32[34,50], index: 1, kind: input, shape index: {}]   ;;  %s300_s2 = inlined_call_operand.vmem [shape: f32[1,50], index: 2, kind: input, shape index: {}]   ;;  %s301_s3 = inlined_call_operand.vmem [shape: f32[50,30], index: 3, kind: input, shape index: {}]   ;;  %s302_s4 = inlined_call_operand.vmem [shape: f32[1,30], index: 4, kind: input, shape index: {}]   ;;  %s303_s5 = inlined_call_operand.vmem [shape: f32[30,128], index: 5, kind: input, shape index: {}]   ;;  %s304_s6 = inlined_call_operand.vmem [shape: f32[1,128], index: 6, kind: input, shape index: {}]   ;;  %s305_s7 = inlined_call_operand.hbm [shape: f32[8,128], index: 7, kind: output, shape index: {}]  }
   0x1   :  { %v32_v0 = vld [vmem:[%s299_s1 + $0x20] sm:$0x3]  ;;  %v31_v1 = vld [vmem:[%s299_s1 + $0x18] sm:$0xff]  ;;  %v30_v2 = vld [vmem:[%s299_s1 + $0x10] sm:$0xff] }
   0x2   :  { %158 = vmatpush.msk.msra.mxu0 %vm41_vm0, %v32_v0  ;;  %v72_v3 = vld [vmem:[%s301_s3 + $0x30] sm:$0x3]  ;;  %v71_v4 = vld [vmem:[%s301_s3 + $0x28] sm:$0xff]  ;;  %v70_v6 = vld [vmem:[%s301_s3 + $0x20] sm:$0xff] }
   0x3   :  { %v29_v5 = vld [vmem:[%s299_s1 + $0x8] sm:$0xff]  ;;  %160 = vmatpush.msk.msra.mxu1 %vm41_vm0, %v72_v3 }
   0x4   :  { %57 = vmatpush.msra.mxu0 %v31_v1 }
   0x5   :  { %12 = vsyncpa [#allocation3], 0  ;;  %94 = vmatpush.msra.mxu1 %v71_v4  ;;  %v28_v7 = vld [vmem:[%s299_s1] sm:$0xff]  ;;  %v69_v8 = vld [vmem:[%s301_s3 + $0x18] sm:$0xff]  ;;  %vm37_vm1 = vcmask 277504   ;;  %vm117_vm2 = vcmask 1045504  }
   0x6   :  { %58 = vmatpush.msra.mxu0 %v30_v2  ;;  %v27_v9 = vld [vmem:[%s298_s0] sm:$0xff]  ;;  %v68_v10 = vld [vmem:[%s301_s3 + $0x10] sm:$0xff]  ;;  %v67_v11 = vld [vmem:[%s301_s3 + $0x8] sm:$0xff]  ;;  %vm77_vm3 = vcmask 408576   ;;  %vm113_vm4 = vcmask 244736   ;;  %s194_s14 = smov [#allocation2]  }
   0x7   :  { %95 = vmatpush.msra.mxu1 %v70_v6  ;;  %v66_v12 = vld [vmem:[%s301_s3] sm:$0xff]  ;;  %v108_v13 = vld [vmem:[%s303_s5 + $0x18] sm:$0x3f]  ;;  %v107_v18 = vld [vmem:[%s303_s5 + $0x10] sm:$0xff]  ;;  %s147_s15 = sshll.u32 %s194_s14, 4  ;;  %s148_s15 = int_to_ptr.vmem [resolvable:$true] %s147_s15 }
   0x8   :  { %59 = vmatpush.msra.mxu0 %v29_v5  ;;  %162 = vmatpush.msk.msra.mxu2 %vm117_vm2, %v108_v13  ;;  %v165_v14 = vld [vmem:[%s300_s2] ss:$0 sm:$0xff]  ;;  %v106_v19 = vld [vmem:[%s303_s5 + $0x8] sm:$0xff] }
   0x9   :  { %96 = vmatpush.msra.mxu1 %v69_v8  ;;  %v105_v20 = vld [vmem:[%s303_s5] sm:$0xff]  ;;  %s149_s5 = sshll.u32 %s305_s7, 4  ;;  %s150_s5 = int_to_ptr.hbm [resolvable:$true] %s149_s5 }
   0xa   :  { %60 = vmatpush.msra.mxu0 %v28_v7  ;;  %134 = vmatpush.msra.mxu2 %v107_v18  ;;  %v166_v21 = vld [vmem:[%s302_s4] ss:$0 sm:$0xff] }
   0xb   :  { %159 = vmatmul.msk.f32.vlgmr.msra.gmra.mxu0 %vm37_vm1, %v27_v9  ;;  %97 = vmatpush.msra.mxu1 %v68_v10  ;;  %v167_v25 = vld [vmem:[%s304_s6] ss:$0 sm:$0xff] }
   0xc   :  { %135 = vmatpush.msra.mxu2 %v106_v19 }
   0xd   :  { %98 = vmatpush.msra.mxu1 %v67_v11 }
   0xe   :  { %136 = vmatpush.msra.mxu2 %v105_v20 }
   0xf   :  { %99 = vmatpush.msra.mxu1 %v66_v12 }
  0x88   :  { %v62_v15 = vpop.f32.mrf.mxu0 }
  0x89   :  { %v63_v16 = vadd.f32 %v165_v14, %v62_v15 }
  0x8b   :  { %v65_v17 = vmax.f32 %v63_v16, 0.0 }
  0x8d   :  { %161 = vmatmul.msk.f32.vlgmr.msra.gmra.mxu1 %vm77_vm3, %v65_v17 }
 0x10a   :  { %v101_v22 = vpop.f32.mrf.mxu1 }
 0x10b   :  { %v102_v23 = vadd.f32 %v166_v21, %v101_v22 }
 0x10d   :  { %v104_v24 = vmax.f32 %v102_v23, 0.0 }
 0x10f   :  { %163 = vmatmul.msk.f32.vlgmr.msra.gmra.mxu2 %vm113_vm4, %v104_v24 }
 0x192   :  { %v138_v26 = vpop.f32.mrf.mxu2 }
 0x193   :  { %v139_v27 = vadd.f32 %v167_v25, %v138_v26 }
 0x195   :  { %141 = vst [vmem:[#allocation2] sm:$0xff] %v139_v27 }
 0x196   :  { %152 = dma.vmem_to_hbm [thread:$0]  %s148_s15, 128, %s150_s5, [#allocation3]  }
 0x197   :  { %192 = dma.done.wait [#allocation3], 128  }
 0x198   :  { %193 = vsyncadd [#allocation3], 4294967168 }
 0x199   :  { %157 = vsyncpa [#allocation3], 1 }

</bundles_post_ra>
